<compile_context>
chip_gen: v5e
topology: v5e:2x2
jax: 0.10.0
libtpu: 0.0.40
codegen_flags: <defaults>
</compile_context>

<pallas_src>
import functools

import jax
import jax.numpy as jnp
import numpy as np
from jax.experimental import pallas as pl
from jax.experimental.pallas import tpu as pltpu

# ---------------- module hyper-parameters (match the torch defaults) ---------
CHANNELS = 16            # x.shape[1]
REDUCTION = 4
K = 2                    # number of piecewise-linear branches
HIDDEN = CHANNELS // REDUCTION     # fc1 output width
N_NODES = 8
BATCH = 4                # graphs per forward

# registered buffers (constant) -> baked in as python floats
LAMBDAS = tuple([1.0] * K + [0.5] * K)          # [2k]
INIT_V = tuple([1.0] + [0.0] * (2 * K - 1))     # [2k]


# ------------------------------ Pallas kernel --------------------------------
def dyrelue_kernel(x_ref, a_ref, am_ref, wcat_ref, bcat_ref, w2_ref, b2_ref,
                   o_ref, *, graphs, n_nodes):
    """DyReLU-E forward for one chunk of `graphs` graphs (one grid step).

    x_ref   : [G*N, C]      node features, graphs stacked along rows
    a_ref   : [G, N, N]     normalized adjacencies (GCN propagation matrices)
    am_ref  : [G, G*N]      block-diagonal row-means of A_hat (fc1 node-mean)
    wcat_ref: [C, H+1]      [fc1 weight^T | pos weight^T]
    bcat_ref: [1, H+1]      [fc1 bias     | pos bias]
    w2_ref  : [H, 2k*C]     fc2 weight, column s*C + c  == torch row c*2k + s
    b2_ref  : [1, 2k*C]     fc2 bias, same packing
    o_ref   : [G*N, C]      result
    """
    G, N = graphs, n_nodes
    x = x_ref[...]                                   # [G*N, C]
    bcat = bcat_ref[...]                             # [1, H+1]

    # --- one batched input projection for both GCN branches, all graphs ------
    xw = jnp.dot(x, wcat_ref[...], preferred_element_type=jnp.float32)  # [G*N, H+1]

    # --- fc1 branch: node-mean folded into one block-diagonal matmul ---------
    # mean_i(A_hat X W1)_i == (row-mean of A_hat) @ (X W1); the row-means are
    # precomputed in the wrapper and laid out block-diagonally per graph.
    t1 = jnp.dot(am_ref[...], xw, preferred_element_type=jnp.float32) + bcat  # [G, H+1]
    theta = jnp.maximum(t1[:, :HIDDEN], 0.0)                                  # [G, H]

    # --- fc2, fused over all graphs and all 2k*C outputs ---------------------
    t2 = jnp.dot(theta, w2_ref[...], preferred_element_type=jnp.float32) + b2_ref[...]
    t2 = 2.0 * jax.nn.sigmoid(t2) - 1.0                                       # [G, 2kC]

    # --- pos branch + dynamic ReLU, per graph (short static unroll, G <= 4) --
    xp = xw[:, HIDDEN:]                               # [G*N, 1] pre-propagation pos column
    bp = bcat[:, HIDDEN:]                             # [1, 1]
    scale = float(N) / 3.0

    for g in range(G):
        r0 = g * N
        a_g = a_ref[g]                                # [N, N]
        # per-node propagation of the single pos column
        pos_pre = jnp.dot(a_g, xp[r0:r0 + N, :],
                          preferred_element_type=jnp.float32) + bp           # [N, 1]
        z = pos_pre * 0.1                                                     # /10
        z = z - jnp.max(z, axis=0, keepdims=True)                             # softmax over nodes
        ez = jnp.exp(z)
        denom = jnp.sum(ez, axis=0, keepdims=True)
        sm = ez * pl.reciprocal(denom, approx=True)                           # EUP reciprocal
        pos = jnp.minimum(sm * scale, 1.0)                                    # [N, 1]

        # dynamic ReLU: max_j (x * a_j + b_j), coefs gated per node by `pos`
        x_g = x[r0:r0 + N, :]                         # [N, C]
        coef = t2[g:g + 1, :]                         # [1, 2kC]
        out = None
        for j in range(K):
            a_c = coef[:, j * CHANNELS:(j + 1) * CHANNELS]               # [1, C]
            b_c = coef[:, (K + j) * CHANNELS:(K + j + 1) * CHANNELS]     # [1, C]
            aj = a_c * pos * LAMBDAS[j] + INIT_V[j]                      # [N, C]
            bj = b_c * pos * LAMBDAS[K + j] + INIT_V[K + j]              # [N, C]
            val = x_g * aj + bj
            out = val if out is None else jnp.maximum(out, val)
        o_ref[pl.ds(r0, N), :] = out


def dyrelue_pallas(x_flat, a_norm, amean_blk, wcat, bcat, w2p, b2p, *,
                   graphs_per_block):
    """x_flat: [B*N, C]; a_norm: [B, N, N]; amean_blk: [num_blocks, G, G*N]."""
    BN, C = x_flat.shape
    B, N, _ = a_norm.shape
    G = graphs_per_block
    assert B % G == 0
    num_blocks = B // G
    H1 = wcat.shape[1]
    H = w2p.shape[0]
    KC = w2p.shape[1]
    kernel = functools.partial(dyrelue_kernel, graphs=G, n_nodes=N)
    return pl.pallas_call(
        kernel,
        out_shape=jax.ShapeDtypeStruct((BN, C), jnp.float32),
        grid=(num_blocks,),
        in_specs=[
            pl.BlockSpec((G * N, C), lambda i: (i, 0)),           # x (per chunk)
            pl.BlockSpec((G, N, N), lambda i: (i, 0, 0)),         # A_hat (per chunk)
            pl.BlockSpec((None, G, G * N), lambda i: (i, 0, 0)),  # mean blocks (per chunk)
            pl.BlockSpec((C, H1), lambda i: (0, 0)),              # wcat (shared)
            pl.BlockSpec((1, H1), lambda i: (0, 0)),              # bcat (shared)
            pl.BlockSpec((H, KC), lambda i: (0, 0)),              # w2 packed (shared)
            pl.BlockSpec((1, KC), lambda i: (0, 0)),              # b2 packed (shared)
        ],
        out_specs=pl.BlockSpec((G * N, C), lambda i: (i, 0)),
        compiler_params=pltpu.CompilerParams(dimension_semantics=("parallel",)),
    )(x_flat, a_norm, amean_blk, wcat, bcat, w2p, b2p)


# ------------------------------ JAX glue --------------------------------------
def build_gcn_adjacency(edge_index, num_nodes):
    """Dense A_hat = D^-1/2 (A + I) D^-1/2 (message flows src -> dst)."""
    src, dst = edge_index[0], edge_index[1]
    a = jnp.zeros((num_nodes, num_nodes), jnp.float32)
    a = a.at[dst, src].add(1.0)
    a = a + jnp.eye(num_nodes, dtype=jnp.float32)
    deg = a.sum(axis=1)
    dinv = 1.0 / jnp.sqrt(deg)
    return a * dinv[:, None] * dinv[None, :]


def build_mean_blocks(a_norm, graphs_per_block):
    """Row-mean of A_hat per graph, laid out block-diagonally per grid step.

    Returns [num_blocks, G, G*N] with blk[i, g, g*N + n] = mean_r a[i*G+g, r, n],
    so a single [G, G*N] @ [G*N, H+1] matmul applies the fc1 node-mean of every
    graph in the step at once.
    """
    B, N, _ = a_norm.shape
    G = graphs_per_block
    nb = B // G
    amean = jnp.mean(a_norm, axis=1).reshape(nb, G, N)          # [nb, G, N]
    eye = jnp.eye(G, dtype=a_norm.dtype)                        # [G, G]
    blk = jnp.einsum("ign,gh->ighn", amean, eye)                # [nb, G, G, N]
    return blk.reshape(nb, G, G * N)


def default_graph_blocks(batch):
    """2-way 'parallel' grid on v7x (2 TensorCores/chip); single step elsewhere."""
    try:
        kind = jax.devices()[0].device_kind.lower()
    except Exception:
        return 1
    if batch % 2 == 0 and ("v7" in kind or "7x" in kind):
        return 2
    return 1


def init_params(key):
    """Deterministic synthetic parameters with the torch module's layouts."""
    k1, k2, k3, k4, k5, k6 = jax.random.split(key, 6)
    # fc1 GCNConv lin weight: torch [H, C] -> stored transposed [C, H]
    w1_t = jax.random.normal(k1, (CHANNELS, HIDDEN), jnp.float32) * 0.3
    b1 = jax.random.normal(k2, (1, HIDDEN), jnp.float32) * 0.1
    # fc2: Linear(H, 2*k*C) -> torch weight [2kC, H], bias [2kC]
    w2_full = jax.random.normal(k3, (2 * K * CHANNELS, HIDDEN), jnp.float32) * 0.3
    b2_full = jax.random.normal(k4, (2 * K * CHANNELS,), jnp.float32) * 0.1
    # pos GCNConv(C, 1): torch weight [1, C] -> transposed [C, 1]
    wp_t = jax.random.normal(k5, (CHANNELS, 1), jnp.float32) * 0.3
    bp = jax.random.normal(k6, (1, 1), jnp.float32) * 0.1
    return w1_t, b1, w2_full, b2_full, wp_t, bp


def pack_params(w1_t, b1, w2_full, b2_full, wp_t, bp):
    """Consolidate the tiny params into 4 kernel inputs."""
    wcat = jnp.concatenate([w1_t, wp_t], axis=1)             # [C, H+1]
    bcat = jnp.concatenate([b1, bp], axis=1)                  # [1, H+1]
    # w2p[h, s*C + c] = w2_full[c*2K + s, h]  (torch view(-1, C, 2k) layout)
    w2p = (w2_full.reshape(CHANNELS, 2 * K, HIDDEN)
           .transpose(2, 1, 0)
           .reshape(HIDDEN, 2 * K * CHANNELS))                # [H, 2kC]
    b2p = b2_full.reshape(CHANNELS, 2 * K).T.reshape(1, 2 * K * CHANNELS)
    return wcat, bcat, w2p, b2p


def dyrelue_reference(x, a, w1_t, b1, w2_full, b2_full, wp_t, bp):
    """Pure-JAX reference (HIGHEST-precision matmuls) for one graph."""
    n = x.shape[0]
    P = jax.lax.Precision.HIGHEST
    lambdas = jnp.asarray(LAMBDAS, jnp.float32)
    init_v = jnp.asarray(INIT_V, jnp.float32)
    # get_relu_coefs: GCNConv -> mean over nodes -> ReLU -> fc2 -> 2*sigmoid-1
    h = jnp.dot(a, jnp.dot(x, w1_t, precision=P), precision=P) + b1   # [N, H]
    theta = jnp.maximum(h.mean(axis=0), 0.0)                          # [H]
    t = jnp.dot(w2_full, theta, precision=P) + b2_full                # [2kC]
    t = 2.0 * jax.nn.sigmoid(t) - 1.0
    relu_coefs0 = t.reshape(CHANNELS, 2 * K)                          # [C, 2k]
    # pos_coefs
    p = (jnp.dot(a, jnp.dot(x, wp_t, precision=P), precision=P) + bp)[:, 0] / 10.0
    pos = jnp.minimum(jax.nn.softmax(p) * (n / 3.0), 1.0)             # [N]
    rc = relu_coefs0[None, :, :] * pos[:, None, None] * lambdas + init_v  # [N, C, 2k]
    out = x[:, :, None] * rc[:, :, :K] + rc[:, :, K:]                 # [N, C, k]
    return out.max(axis=-1)                                           # [N, C]


if __name__ == "__main__":
    key = jax.random.PRNGKey(0)
    kx, kp = jax.random.split(key)

    # node features [B, N, C]
    x = jax.random.normal(kx, (BATCH, N_NODES, CHANNELS), jnp.float32)

    # per-graph undirected ring plus one graph-specific chord: edge_index [2, E]
    a_list = []
    for b in range(BATCH):
        src = np.arange(N_NODES)
        dst = (src + 1) % N_NODES
        cs = np.array([0], dtype=np.int64)
        cd = np.array([(2 + b) % N_NODES], dtype=np.int64)
        s = np.concatenate([src, dst, cs, cd])
        d = np.concatenate([dst, src, cd, cs])
        edge_index = jnp.asarray(np.stack([s, d]), dtype=jnp.int32)
        a_list.append(build_gcn_adjacency(edge_index, N_NODES))
    a_norm = jnp.stack(a_list)                              # [B, N, N]

    w1_t, b1, w2_full, b2_full, wp_t, bp = init_params(kp)
    wcat, bcat, w2p, b2p = pack_params(w1_t, b1, w2_full, b2_full, wp_t, bp)

    num_blocks = default_graph_blocks(BATCH)                # 2 on v7x, else 1
    G = BATCH // num_blocks
    x_flat = x.reshape(BATCH * N_NODES, CHANNELS)           # [B*N, C]
    amean_blk = build_mean_blocks(a_norm, G)                # [num_blocks, G, G*N]

    out_flat = dyrelue_pallas(x_flat, a_norm, amean_blk, wcat, bcat, w2p, b2p,
                              graphs_per_block=G)
    out_flat = jax.block_until_ready(out_flat)
    out = out_flat.reshape(BATCH, N_NODES, CHANNELS)

    ref = jnp.stack([
        dyrelue_reference(x[b], a_norm[b], w1_t, b1, w2_full, b2_full, wp_t, bp)
        for b in range(BATCH)
    ])
    # kernel runs default (bf16-multiply / f32-accumulate) MXU precision,
    # reference runs HIGHEST -> loosened tolerance.
    np.testing.assert_allclose(np.asarray(out), np.asarray(ref), rtol=2e-2, atol=2e-2)

    print("KERNEL_OK")
</pallas_src>

<mosaic_0001>
module attributes {stable_mosaic.version = 11 : i64} {
  func.func @dyrelue_kernel(%arg0: i32, %arg1: memref<32x16xf32, #tpu.memory_space<vmem>>, %arg2: memref<4x8x8xf32, #tpu.memory_space<vmem>>, %arg3: memref<1x4x32xf32, #tpu.memory_space<vmem>>, %arg4: memref<16x5xf32, #tpu.memory_space<vmem>>, %arg5: memref<1x5xf32, #tpu.memory_space<vmem>>, %arg6: memref<4x64xf32, #tpu.memory_space<vmem>>, %arg7: memref<1x64xf32, #tpu.memory_space<vmem>>, %arg8: memref<32x16xf32, #tpu.memory_space<vmem>>) attributes {dimension_semantics = [#tpu.dimension_semantics<parallel>], iteration_bounds = array<i64: 1>, scalar_prefetch = 0 : i64, scratch_operands = 0 : i64, tpu.core_type = #tpu.core_type<tc>, window_params = [{transform_indices = @transform_0, window_bounds = array<i64: 32, 16>}, {transform_indices = @transform_1, window_bounds = array<i64: 4, 8, 8>}, {transform_indices = @transform_2, window_bounds = array<i64: 1, 4, 32>}, {pipeline_mode = #tpu.pipeline_mode<synchronous>, transform_indices = @transform_3, window_bounds = array<i64: 16, 5>}, {pipeline_mode = #tpu.pipeline_mode<synchronous>, transform_indices = @transform_4, window_bounds = array<i64: 1, 5>}, {pipeline_mode = #tpu.pipeline_mode<synchronous>, transform_indices = @transform_5, window_bounds = array<i64: 4, 64>}, {pipeline_mode = #tpu.pipeline_mode<synchronous>, transform_indices = @transform_6, window_bounds = array<i64: 1, 64>}, {transform_indices = @transform_7, window_bounds = array<i64: 32, 16>}]} {
    %c0 = arith.constant 0 : index
    %c0_0 = arith.constant 0 : index
    %0 = vector.load %arg1[%c0, %c0_0] : memref<32x16xf32, #tpu.memory_space<vmem>>, vector<32x16xf32>
    %c0_1 = arith.constant 0 : index
    %c0_2 = arith.constant 0 : index
    %1 = vector.load %arg5[%c0_1, %c0_2] : memref<1x5xf32, #tpu.memory_space<vmem>>, vector<1x5xf32>
    %c0_3 = arith.constant 0 : index
    %c0_4 = arith.constant 0 : index
    %2 = vector.load %arg4[%c0_3, %c0_4] : memref<16x5xf32, #tpu.memory_space<vmem>>, vector<16x5xf32>
    %cst = arith.constant dense<0.000000e+00> : vector<32x5xf32>
    %3 = tpu.matmul %0, %2, %cst {dimension_numbers = #tpu.dot_dimension_numbers<[1], [0], [0], [1], [0, 0, 1, 1], [], []>} : vector<32x16xf32>, vector<16x5xf32>, vector<32x5xf32> -> vector<32x5xf32>
    %c0_5 = arith.constant 0 : index
    %c0_6 = arith.constant 0 : index
    %c0_7 = arith.constant 0 : index
    %4 = vector.load %arg3[%c0_5, %c0_6, %c0_7] : memref<1x4x32xf32, #tpu.memory_space<vmem>>, vector<1x4x32xf32>
    %5 = vector.shape_cast %4 : vector<1x4x32xf32> to vector<4x32xf32>
    %cst_8 = arith.constant dense<0.000000e+00> : vector<4x5xf32>
    %6 = tpu.matmul %5, %3, %cst_8 {dimension_numbers = #tpu.dot_dimension_numbers<[1], [0], [0], [1], [0, 0, 1, 1], [], []>} : vector<4x32xf32>, vector<32x5xf32>, vector<4x5xf32> -> vector<4x5xf32>
    %7 = vector.broadcast %1 : vector<1x5xf32> to vector<4x5xf32>
    %8 = arith.addf %6, %7 : vector<4x5xf32>
    %9 = vector.extract_strided_slice %8 {offsets = [0, 0], sizes = [4, 4], strides = [1, 1]} : vector<4x5xf32> to vector<4x4xf32>
    %cst_9 = arith.constant 0.000000e+00 : f32
    %10 = vector.broadcast %cst_9 : f32 to vector<4x4xf32>
    %11 = arith.maximumf %9, %10 : vector<4x4xf32>
    %c0_10 = arith.constant 0 : index
    %c0_11 = arith.constant 0 : index
    %12 = vector.load %arg6[%c0_10, %c0_11] : memref<4x64xf32, #tpu.memory_space<vmem>>, vector<4x64xf32>
    %cst_12 = arith.constant dense<0.000000e+00> : vector<4x64xf32>
    %13 = tpu.matmul %11, %12, %cst_12 {dimension_numbers = #tpu.dot_dimension_numbers<[1], [0], [0], [1], [0, 0, 1, 1], [], []>} : vector<4x4xf32>, vector<4x64xf32>, vector<4x64xf32> -> vector<4x64xf32>
    %c0_13 = arith.constant 0 : index
    %c0_14 = arith.constant 0 : index
    %14 = vector.load %arg7[%c0_13, %c0_14] : memref<1x64xf32, #tpu.memory_space<vmem>>, vector<1x64xf32>
    %15 = vector.broadcast %14 : vector<1x64xf32> to vector<4x64xf32>
    %16 = arith.addf %13, %15 : vector<4x64xf32>
    %17 = arith.negf %16 : vector<4x64xf32>
    %18 = math.exp %17 : vector<4x64xf32>
    %cst_15 = arith.constant 1.000000e+00 : f32
    %19 = vector.broadcast %cst_15 : f32 to vector<4x64xf32>
    %20 = arith.addf %19, %18 : vector<4x64xf32>
    %21 = arith.divf %19, %20 : vector<4x64xf32>
    %cst_16 = arith.constant 2.000000e+00 : f32
    %22 = vector.broadcast %cst_16 : f32 to vector<4x64xf32>
    %23 = arith.mulf %22, %21 : vector<4x64xf32>
    %cst_17 = arith.constant 1.000000e+00 : f32
    %24 = vector.broadcast %cst_17 : f32 to vector<4x64xf32>
    %25 = arith.subf %23, %24 : vector<4x64xf32>
    %26 = vector.extract_strided_slice %3 {offsets = [0, 4], sizes = [32, 1], strides = [1, 1]} : vector<32x5xf32> to vector<32x1xf32>
    %27 = vector.extract_strided_slice %1 {offsets = [0, 4], sizes = [1, 1], strides = [1, 1]} : vector<1x5xf32> to vector<1x1xf32>
    %c0_18 = arith.constant 0 : index
    %c0_19 = arith.constant 0 : index
    %c0_20 = arith.constant 0 : index
    %28 = vector.load %arg2[%c0_18, %c0_19, %c0_20] : memref<4x8x8xf32, #tpu.memory_space<vmem>>, vector<1x8x8xf32>
    %29 = vector.shape_cast %28 : vector<1x8x8xf32> to vector<8x8xf32>
    %30 = vector.extract_strided_slice %26 {offsets = [0, 0], sizes = [8, 1], strides = [1, 1]} : vector<32x1xf32> to vector<8x1xf32>
    %cst_21 = arith.constant dense<0.000000e+00> : vector<8x1xf32>
    %31 = tpu.matmul %29, %30, %cst_21 {dimension_numbers = #tpu.dot_dimension_numbers<[1], [0], [0], [1], [0, 0, 1, 1], [], []>} : vector<8x8xf32>, vector<8x1xf32>, vector<8x1xf32> -> vector<8x1xf32>
    %32 = vector.broadcast %27 : vector<1x1xf32> to vector<8x1xf32>
    %33 = arith.addf %31, %32 : vector<8x1xf32>
    %cst_22 = arith.constant 1.000000e-01 : f32
    %34 = vector.broadcast %cst_22 : f32 to vector<8x1xf32>
    %35 = arith.mulf %33, %34 : vector<8x1xf32>
    %cst_23 = arith.constant dense<0xFF800000> : vector<1xf32>
    %36 = vector.multi_reduction <maximumf>, %35, %cst_23 [0] : vector<8x1xf32> to vector<1xf32>
    %37 = vector.shape_cast %36 : vector<1xf32> to vector<1x1xf32>
    %38 = vector.broadcast %37 : vector<1x1xf32> to vector<8x1xf32>
    %39 = arith.subf %35, %38 : vector<8x1xf32>
    %40 = math.exp %39 : vector<8x1xf32>
    %cst_24 = arith.constant dense<0.000000e+00> : vector<1xf32>
    %41 = vector.multi_reduction <add>, %40, %cst_24 [0] : vector<8x1xf32> to vector<1xf32>
    %42 = vector.shape_cast %41 : vector<1xf32> to vector<1x1xf32>
    %43 = tpu.reciprocal %42 {approx = true} : vector<1x1xf32> -> vector<1x1xf32>
    %44 = vector.broadcast %43 : vector<1x1xf32> to vector<8x1xf32>
    %45 = arith.mulf %40, %44 : vector<8x1xf32>
    %cst_25 = arith.constant 2.66666675 : f32
    %46 = vector.broadcast %cst_25 : f32 to vector<8x1xf32>
    %47 = arith.mulf %45, %46 : vector<8x1xf32>
    %cst_26 = arith.constant 1.000000e+00 : f32
    %48 = vector.broadcast %cst_26 : f32 to vector<8x1xf32>
    %49 = arith.minimumf %47, %48 : vector<8x1xf32>
    %50 = vector.extract_strided_slice %0 {offsets = [0, 0], sizes = [8, 16], strides = [1, 1]} : vector<32x16xf32> to vector<8x16xf32>
    %51 = vector.extract_strided_slice %25 {offsets = [0, 0], sizes = [1, 64], strides = [1, 1]} : vector<4x64xf32> to vector<1x64xf32>
    %52 = vector.extract_strided_slice %51 {offsets = [0, 0], sizes = [1, 16], strides = [1, 1]} : vector<1x64xf32> to vector<1x16xf32>
    %53 = vector.extract_strided_slice %51 {offsets = [0, 32], sizes = [1, 16], strides = [1, 1]} : vector<1x64xf32> to vector<1x16xf32>
    %54 = vector.broadcast %52 : vector<1x16xf32> to vector<8x16xf32>
    %55 = vector.broadcast %49 : vector<8x1xf32> to vector<8x16xf32>
    %56 = arith.mulf %54, %55 : vector<8x16xf32>
    %cst_27 = arith.constant 1.000000e+00 : f32
    %57 = vector.broadcast %cst_27 : f32 to vector<8x16xf32>
    %58 = arith.mulf %56, %57 : vector<8x16xf32>
    %cst_28 = arith.constant 1.000000e+00 : f32
    %59 = vector.broadcast %cst_28 : f32 to vector<8x16xf32>
    %60 = arith.addf %58, %59 : vector<8x16xf32>
    %61 = vector.broadcast %53 : vector<1x16xf32> to vector<8x16xf32>
    %62 = vector.broadcast %49 : vector<8x1xf32> to vector<8x16xf32>
    %63 = arith.mulf %61, %62 : vector<8x16xf32>
    %cst_29 = arith.constant 5.000000e-01 : f32
    %64 = vector.broadcast %cst_29 : f32 to vector<8x16xf32>
    %65 = arith.mulf %63, %64 : vector<8x16xf32>
    %cst_30 = arith.constant 0.000000e+00 : f32
    %66 = vector.broadcast %cst_30 : f32 to vector<8x16xf32>
    %67 = arith.addf %65, %66 : vector<8x16xf32>
    %68 = arith.mulf %50, %60 : vector<8x16xf32>
    %69 = arith.addf %68, %67 : vector<8x16xf32>
    %70 = vector.extract_strided_slice %51 {offsets = [0, 16], sizes = [1, 16], strides = [1, 1]} : vector<1x64xf32> to vector<1x16xf32>
    %71 = vector.extract_strided_slice %51 {offsets = [0, 48], sizes = [1, 16], strides = [1, 1]} : vector<1x64xf32> to vector<1x16xf32>
    %72 = vector.broadcast %70 : vector<1x16xf32> to vector<8x16xf32>
    %73 = vector.broadcast %49 : vector<8x1xf32> to vector<8x16xf32>
    %74 = arith.mulf %72, %73 : vector<8x16xf32>
    %cst_31 = arith.constant 1.000000e+00 : f32
    %75 = vector.broadcast %cst_31 : f32 to vector<8x16xf32>
    %76 = arith.mulf %74, %75 : vector<8x16xf32>
    %cst_32 = arith.constant 0.000000e+00 : f32
    %77 = vector.broadcast %cst_32 : f32 to vector<8x16xf32>
    %78 = arith.addf %76, %77 : vector<8x16xf32>
    %79 = vector.broadcast %71 : vector<1x16xf32> to vector<8x16xf32>
    %80 = vector.broadcast %49 : vector<8x1xf32> to vector<8x16xf32>
    %81 = arith.mulf %79, %80 : vector<8x16xf32>
    %cst_33 = arith.constant 5.000000e-01 : f32
    %82 = vector.broadcast %cst_33 : f32 to vector<8x16xf32>
    %83 = arith.mulf %81, %82 : vector<8x16xf32>
    %cst_34 = arith.constant 0.000000e+00 : f32
    %84 = vector.broadcast %cst_34 : f32 to vector<8x16xf32>
    %85 = arith.addf %83, %84 : vector<8x16xf32>
    %86 = arith.mulf %50, %78 : vector<8x16xf32>
    %87 = arith.addf %86, %85 : vector<8x16xf32>
    %88 = arith.maximumf %69, %87 : vector<8x16xf32>
    %c0_35 = arith.constant 0 : index
    %c0_36 = arith.constant 0 : index
    %89 = vector.load %arg8[%c0_35, %c0_36] : memref<32x16xf32, #tpu.memory_space<vmem>>, vector<8x16xf32>
    tpu.vector_store %arg8[%c0_35, %c0_36], %88 {strides = array<i32>} : memref<32x16xf32, #tpu.memory_space<vmem>>, vector<8x16xf32>,
    %c1 = arith.constant 1 : index
    %c0_37 = arith.constant 0 : index
    %c0_38 = arith.constant 0 : index
    %90 = vector.load %arg2[%c1, %c0_37, %c0_38] : memref<4x8x8xf32, #tpu.memory_space<vmem>>, vector<1x8x8xf32>
    %91 = vector.shape_cast %90 : vector<1x8x8xf32> to vector<8x8xf32>
    %92 = vector.extract_strided_slice %26 {offsets = [8, 0], sizes = [8, 1], strides = [1, 1]} : vector<32x1xf32> to vector<8x1xf32>
    %cst_39 = arith.constant dense<0.000000e+00> : vector<8x1xf32>
    %93 = tpu.matmul %91, %92, %cst_39 {dimension_numbers = #tpu.dot_dimension_numbers<[1], [0], [0], [1], [0, 0, 1, 1], [], []>} : vector<8x8xf32>, vector<8x1xf32>, vector<8x1xf32> -> vector<8x1xf32>
    %94 = vector.broadcast %27 : vector<1x1xf32> to vector<8x1xf32>
    %95 = arith.addf %93, %94 : vector<8x1xf32>
    %cst_40 = arith.constant 1.000000e-01 : f32
    %96 = vector.broadcast %cst_40 : f32 to vector<8x1xf32>
    %97 = arith.mulf %95, %96 : vector<8x1xf32>
    %cst_41 = arith.constant dense<0xFF800000> : vector<1xf32>
    %98 = vector.multi_reduction <maximumf>, %97, %cst_41 [0] : vector<8x1xf32> to vector<1xf32>
    %99 = vector.shape_cast %98 : vector<1xf32> to vector<1x1xf32>
    %100 = vector.broadcast %99 : vector<1x1xf32> to vector<8x1xf32>
    %101 = arith.subf %97, %100 : vector<8x1xf32>
    %102 = math.exp %101 : vector<8x1xf32>
    %cst_42 = arith.constant dense<0.000000e+00> : vector<1xf32>
    %103 = vector.multi_reduction <add>, %102, %cst_42 [0] : vector<8x1xf32> to vector<1xf32>
    %104 = vector.shape_cast %103 : vector<1xf32> to vector<1x1xf32>
    %105 = tpu.reciprocal %104 {approx = true} : vector<1x1xf32> -> vector<1x1xf32>
    %106 = vector.broadcast %105 : vector<1x1xf32> to vector<8x1xf32>
    %107 = arith.mulf %102, %106 : vector<8x1xf32>
    %cst_43 = arith.constant 2.66666675 : f32
    %108 = vector.broadcast %cst_43 : f32 to vector<8x1xf32>
    %109 = arith.mulf %107, %108 : vector<8x1xf32>
    %cst_44 = arith.constant 1.000000e+00 : f32
    %110 = vector.broadcast %cst_44 : f32 to vector<8x1xf32>
    %111 = arith.minimumf %109, %110 : vector<8x1xf32>
    %112 = vector.extract_strided_slice %0 {offsets = [8, 0], sizes = [8, 16], strides = [1, 1]} : vector<32x16xf32> to vector<8x16xf32>
    %113 = vector.extract_strided_slice %25 {offsets = [1, 0], sizes = [1, 64], strides = [1, 1]} : vector<4x64xf32> to vector<1x64xf32>
    %114 = vector.extract_strided_slice %113 {offsets = [0, 0], sizes = [1, 16], strides = [1, 1]} : vector<1x64xf32> to vector<1x16xf32>
    %115 = vector.extract_strided_slice %113 {offsets = [0, 32], sizes = [1, 16], strides = [1, 1]} : vector<1x64xf32> to vector<1x16xf32>
    %116 = vector.broadcast %114 : vector<1x16xf32> to vector<8x16xf32>
    %117 = vector.broadcast %111 : vector<8x1xf32> to vector<8x16xf32>
    %118 = arith.mulf %116, %117 : vector<8x16xf32>
    %cst_45 = arith.constant 1.000000e+00 : f32
    %119 = vector.broadcast %cst_45 : f32 to vector<8x16xf32>
    %120 = arith.mulf %118, %119 : vector<8x16xf32>
    %cst_46 = arith.constant 1.000000e+00 : f32
    %121 = vector.broadcast %cst_46 : f32 to vector<8x16xf32>
    %122 = arith.addf %120, %121 : vector<8x16xf32>
    %123 = vector.broadcast %115 : vector<1x16xf32> to vector<8x16xf32>
    %124 = vector.broadcast %111 : vector<8x1xf32> to vector<8x16xf32>
    %125 = arith.mulf %123, %124 : vector<8x16xf32>
    %cst_47 = arith.constant 5.000000e-01 : f32
    %126 = vector.broadcast %cst_47 : f32 to vector<8x16xf32>
    %127 = arith.mulf %125, %126 : vector<8x16xf32>
    %cst_48 = arith.constant 0.000000e+00 : f32
    %128 = vector.broadcast %cst_48 : f32 to vector<8x16xf32>
    %129 = arith.addf %127, %128 : vector<8x16xf32>
    %130 = arith.mulf %112, %122 : vector<8x16xf32>
    %131 = arith.addf %130, %129 : vector<8x16xf32>
    %132 = vector.extract_strided_slice %113 {offsets = [0, 16], sizes = [1, 16], strides = [1, 1]} : vector<1x64xf32> to vector<1x16xf32>
    %133 = vector.extract_strided_slice %113 {offsets = [0, 48], sizes = [1, 16], strides = [1, 1]} : vector<1x64xf32> to vector<1x16xf32>
    %134 = vector.broadcast %132 : vector<1x16xf32> to vector<8x16xf32>
    %135 = vector.broadcast %111 : vector<8x1xf32> to vector<8x16xf32>
    %136 = arith.mulf %134, %135 : vector<8x16xf32>
    %cst_49 = arith.constant 1.000000e+00 : f32
    %137 = vector.broadcast %cst_49 : f32 to vector<8x16xf32>
    %138 = arith.mulf %136, %137 : vector<8x16xf32>
    %cst_50 = arith.constant 0.000000e+00 : f32
    %139 = vector.broadcast %cst_50 : f32 to vector<8x16xf32>
    %140 = arith.addf %138, %139 : vector<8x16xf32>
    %141 = vector.broadcast %133 : vector<1x16xf32> to vector<8x16xf32>
    %142 = vector.broadcast %111 : vector<8x1xf32> to vector<8x16xf32>
    %143 = arith.mulf %141, %142 : vector<8x16xf32>
    %cst_51 = arith.constant 5.000000e-01 : f32
    %144 = vector.broadcast %cst_51 : f32 to vector<8x16xf32>
    %145 = arith.mulf %143, %144 : vector<8x16xf32>
    %cst_52 = arith.constant 0.000000e+00 : f32
    %146 = vector.broadcast %cst_52 : f32 to vector<8x16xf32>
    %147 = arith.addf %145, %146 : vector<8x16xf32>
    %148 = arith.mulf %112, %140 : vector<8x16xf32>
    %149 = arith.addf %148, %147 : vector<8x16xf32>
    %150 = arith.maximumf %131, %149 : vector<8x16xf32>
    %c8 = arith.constant 8 : index
    %c0_53 = arith.constant 0 : index
    %151 = vector.load %arg8[%c8, %c0_53] : memref<32x16xf32, #tpu.memory_space<vmem>>, vector<8x16xf32>
    tpu.vector_store %arg8[%c8, %c0_53], %150 {strides = array<i32>} : memref<32x16xf32, #tpu.memory_space<vmem>>, vector<8x16xf32>,
    %c2 = arith.constant 2 : index
    %c0_54 = arith.constant 0 : index
    %c0_55 = arith.constant 0 : index
    %152 = vector.load %arg2[%c2, %c0_54, %c0_55] : memref<4x8x8xf32, #tpu.memory_space<vmem>>, vector<1x8x8xf32>
    %153 = vector.shape_cast %152 : vector<1x8x8xf32> to vector<8x8xf32>
    %154 = vector.extract_strided_slice %26 {offsets = [16, 0], sizes = [8, 1], strides = [1, 1]} : vector<32x1xf32> to vector<8x1xf32>
    %cst_56 = arith.constant dense<0.000000e+00> : vector<8x1xf32>
    %155 = tpu.matmul %153, %154, %cst_56 {dimension_numbers = #tpu.dot_dimension_numbers<[1], [0], [0], [1], [0, 0, 1, 1], [], []>} : vector<8x8xf32>, vector<8x1xf32>, vector<8x1xf32> -> vector<8x1xf32>
    %156 = vector.broadcast %27 : vector<1x1xf32> to vector<8x1xf32>
    %157 = arith.addf %155, %156 : vector<8x1xf32>
    %cst_57 = arith.constant 1.000000e-01 : f32
    %158 = vector.broadcast %cst_57 : f32 to vector<8x1xf32>
    %159 = arith.mulf %157, %158 : vector<8x1xf32>
    %cst_58 = arith.constant dense<0xFF800000> : vector<1xf32>
    %160 = vector.multi_reduction <maximumf>, %159, %cst_58 [0] : vector<8x1xf32> to vector<1xf32>
    %161 = vector.shape_cast %160 : vector<1xf32> to vector<1x1xf32>
    %162 = vector.broadcast %161 : vector<1x1xf32> to vector<8x1xf32>
    %163 = arith.subf %159, %162 : vector<8x1xf32>
    %164 = math.exp %163 : vector<8x1xf32>
    %cst_59 = arith.constant dense<0.000000e+00> : vector<1xf32>
    %165 = vector.multi_reduction <add>, %164, %cst_59 [0] : vector<8x1xf32> to vector<1xf32>
    %166 = vector.shape_cast %165 : vector<1xf32> to vector<1x1xf32>
    %167 = tpu.reciprocal %166 {approx = true} : vector<1x1xf32> -> vector<1x1xf32>
    %168 = vector.broadcast %167 : vector<1x1xf32> to vector<8x1xf32>
    %169 = arith.mulf %164, %168 : vector<8x1xf32>
    %cst_60 = arith.constant 2.66666675 : f32
    %170 = vector.broadcast %cst_60 : f32 to vector<8x1xf32>
    %171 = arith.mulf %169, %170 : vector<8x1xf32>
    %cst_61 = arith.constant 1.000000e+00 : f32
    %172 = vector.broadcast %cst_61 : f32 to vector<8x1xf32>
    %173 = arith.minimumf %171, %172 : vector<8x1xf32>
    %174 = vector.extract_strided_slice %0 {offsets = [16, 0], sizes = [8, 16], strides = [1, 1]} : vector<32x16xf32> to vector<8x16xf32>
    %175 = vector.extract_strided_slice %25 {offsets = [2, 0], sizes = [1, 64], strides = [1, 1]} : vector<4x64xf32> to vector<1x64xf32>
    %176 = vector.extract_strided_slice %175 {offsets = [0, 0], sizes = [1, 16], strides = [1, 1]} : vector<1x64xf32> to vector<1x16xf32>
    %177 = vector.extract_strided_slice %175 {offsets = [0, 32], sizes = [1, 16], strides = [1, 1]} : vector<1x64xf32> to vector<1x16xf32>
    %178 = vector.broadcast %176 : vector<1x16xf32> to vector<8x16xf32>
    %179 = vector.broadcast %173 : vector<8x1xf32> to vector<8x16xf32>
    %180 = arith.mulf %178, %179 : vector<8x16xf32>
    %cst_62 = arith.constant 1.000000e+00 : f32
    %181 = vector.broadcast %cst_62 : f32 to vector<8x16xf32>
    %182 = arith.mulf %180, %181 : vector<8x16xf32>
    %cst_63 = arith.constant 1.000000e+00 : f32
    %183 = vector.broadcast %cst_63 : f32 to vector<8x16xf32>
    %184 = arith.addf %182, %183 : vector<8x16xf32>
    %185 = vector.broadcast %177 : vector<1x16xf32> to vector<8x16xf32>
    %186 = vector.broadcast %173 : vector<8x1xf32> to vector<8x16xf32>
    %187 = arith.mulf %185, %186 : vector<8x16xf32>
    %cst_64 = arith.constant 5.000000e-01 : f32
    %188 = vector.broadcast %cst_64 : f32 to vector<8x16xf32>
    %189 = arith.mulf %187, %188 : vector<8x16xf32>
    %cst_65 = arith.constant 0.000000e+00 : f32
    %190 = vector.broadcast %cst_65 : f32 to vector<8x16xf32>
    %191 = arith.addf %189, %190 : vector<8x16xf32>
    %192 = arith.mulf %174, %184 : vector<8x16xf32>
    %193 = arith.addf %192, %191 : vector<8x16xf32>
    %194 = vector.extract_strided_slice %175 {offsets = [0, 16], sizes = [1, 16], strides = [1, 1]} : vector<1x64xf32> to vector<1x16xf32>
    %195 = vector.extract_strided_slice %175 {offsets = [0, 48], sizes = [1, 16], strides = [1, 1]} : vector<1x64xf32> to vector<1x16xf32>
    %196 = vector.broadcast %194 : vector<1x16xf32> to vector<8x16xf32>
    %197 = vector.broadcast %173 : vector<8x1xf32> to vector<8x16xf32>
    %198 = arith.mulf %196, %197 : vector<8x16xf32>
    %cst_66 = arith.constant 1.000000e+00 : f32
    %199 = vector.broadcast %cst_66 : f32 to vector<8x16xf32>
    %200 = arith.mulf %198, %199 : vector<8x16xf32>
    %cst_67 = arith.constant 0.000000e+00 : f32
    %201 = vector.broadcast %cst_67 : f32 to vector<8x16xf32>
    %202 = arith.addf %200, %201 : vector<8x16xf32>
    %203 = vector.broadcast %195 : vector<1x16xf32> to vector<8x16xf32>
    %204 = vector.broadcast %173 : vector<8x1xf32> to vector<8x16xf32>
    %205 = arith.mulf %203, %204 : vector<8x16xf32>
    %cst_68 = arith.constant 5.000000e-01 : f32
    %206 = vector.broadcast %cst_68 : f32 to vector<8x16xf32>
    %207 = arith.mulf %205, %206 : vector<8x16xf32>
    %cst_69 = arith.constant 0.000000e+00 : f32
    %208 = vector.broadcast %cst_69 : f32 to vector<8x16xf32>
    %209 = arith.addf %207, %208 : vector<8x16xf32>
    %210 = arith.mulf %174, %202 : vector<8x16xf32>
    %211 = arith.addf %210, %209 : vector<8x16xf32>
    %212 = arith.maximumf %193, %211 : vector<8x16xf32>
    %c16 = arith.constant 16 : index
    %c0_70 = arith.constant 0 : index
    %213 = vector.load %arg8[%c16, %c0_70] : memref<32x16xf32, #tpu.memory_space<vmem>>, vector<8x16xf32>
    tpu.vector_store %arg8[%c16, %c0_70], %212 {strides = array<i32>} : memref<32x16xf32, #tpu.memory_space<vmem>>, vector<8x16xf32>,
    %c3 = arith.constant 3 : index
    %c0_71 = arith.constant 0 : index
    %c0_72 = arith.constant 0 : index
    %214 = vector.load %arg2[%c3, %c0_71, %c0_72] : memref<4x8x8xf32, #tpu.memory_space<vmem>>, vector<1x8x8xf32>
    %215 = vector.shape_cast %214 : vector<1x8x8xf32> to vector<8x8xf32>
    %216 = vector.extract_strided_slice %26 {offsets = [24, 0], sizes = [8, 1], strides = [1, 1]} : vector<32x1xf32> to vector<8x1xf32>
    %cst_73 = arith.constant dense<0.000000e+00> : vector<8x1xf32>
    %217 = tpu.matmul %215, %216, %cst_73 {dimension_numbers = #tpu.dot_dimension_numbers<[1], [0], [0], [1], [0, 0, 1, 1], [], []>} : vector<8x8xf32>, vector<8x1xf32>, vector<8x1xf32> -> vector<8x1xf32>
    %218 = vector.broadcast %27 : vector<1x1xf32> to vector<8x1xf32>
    %219 = arith.addf %217, %218 : vector<8x1xf32>
    %cst_74 = arith.constant 1.000000e-01 : f32
    %220 = vector.broadcast %cst_74 : f32 to vector<8x1xf32>
    %221 = arith.mulf %219, %220 : vector<8x1xf32>
    %cst_75 = arith.constant dense<0xFF800000> : vector<1xf32>
    %222 = vector.multi_reduction <maximumf>, %221, %cst_75 [0] : vector<8x1xf32> to vector<1xf32>
    %223 = vector.shape_cast %222 : vector<1xf32> to vector<1x1xf32>
    %224 = vector.broadcast %223 : vector<1x1xf32> to vector<8x1xf32>
    %225 = arith.subf %221, %224 : vector<8x1xf32>
    %226 = math.exp %225 : vector<8x1xf32>
    %cst_76 = arith.constant dense<0.000000e+00> : vector<1xf32>
    %227 = vector.multi_reduction <add>, %226, %cst_76 [0] : vector<8x1xf32> to vector<1xf32>
    %228 = vector.shape_cast %227 : vector<1xf32> to vector<1x1xf32>
    %229 = tpu.reciprocal %228 {approx = true} : vector<1x1xf32> -> vector<1x1xf32>
    %230 = vector.broadcast %229 : vector<1x1xf32> to vector<8x1xf32>
    %231 = arith.mulf %226, %230 : vector<8x1xf32>
    %cst_77 = arith.constant 2.66666675 : f32
    %232 = vector.broadcast %cst_77 : f32 to vector<8x1xf32>
    %233 = arith.mulf %231, %232 : vector<8x1xf32>
    %cst_78 = arith.constant 1.000000e+00 : f32
    %234 = vector.broadcast %cst_78 : f32 to vector<8x1xf32>
    %235 = arith.minimumf %233, %234 : vector<8x1xf32>
    %236 = vector.extract_strided_slice %0 {offsets = [24, 0], sizes = [8, 16], strides = [1, 1]} : vector<32x16xf32> to vector<8x16xf32>
    %237 = vector.extract_strided_slice %25 {offsets = [3, 0], sizes = [1, 64], strides = [1, 1]} : vector<4x64xf32> to vector<1x64xf32>
    %238 = vector.extract_strided_slice %237 {offsets = [0, 0], sizes = [1, 16], strides = [1, 1]} : vector<1x64xf32> to vector<1x16xf32>
    %239 = vector.extract_strided_slice %237 {offsets = [0, 32], sizes = [1, 16], strides = [1, 1]} : vector<1x64xf32> to vector<1x16xf32>
    %240 = vector.broadcast %238 : vector<1x16xf32> to vector<8x16xf32>
    %241 = vector.broadcast %235 : vector<8x1xf32> to vector<8x16xf32>
    %242 = arith.mulf %240, %241 : vector<8x16xf32>
    %cst_79 = arith.constant 1.000000e+00 : f32
    %243 = vector.broadcast %cst_79 : f32 to vector<8x16xf32>
    %244 = arith.mulf %242, %243 : vector<8x16xf32>
    %cst_80 = arith.constant 1.000000e+00 : f32
    %245 = vector.broadcast %cst_80 : f32 to vector<8x16xf32>
    %246 = arith.addf %244, %245 : vector<8x16xf32>
    %247 = vector.broadcast %239 : vector<1x16xf32> to vector<8x16xf32>
    %248 = vector.broadcast %235 : vector<8x1xf32> to vector<8x16xf32>
    %249 = arith.mulf %247, %248 : vector<8x16xf32>
    %cst_81 = arith.constant 5.000000e-01 : f32
    %250 = vector.broadcast %cst_81 : f32 to vector<8x16xf32>
    %251 = arith.mulf %249, %250 : vector<8x16xf32>
    %cst_82 = arith.constant 0.000000e+00 : f32
    %252 = vector.broadcast %cst_82 : f32 to vector<8x16xf32>
    %253 = arith.addf %251, %252 : vector<8x16xf32>
    %254 = arith.mulf %236, %246 : vector<8x16xf32>
    %255 = arith.addf %254, %253 : vector<8x16xf32>
    %256 = vector.extract_strided_slice %237 {offsets = [0, 16], sizes = [1, 16], strides = [1, 1]} : vector<1x64xf32> to vector<1x16xf32>
    %257 = vector.extract_strided_slice %237 {offsets = [0, 48], sizes = [1, 16], strides = [1, 1]} : vector<1x64xf32> to vector<1x16xf32>
    %258 = vector.broadcast %256 : vector<1x16xf32> to vector<8x16xf32>
    %259 = vector.broadcast %235 : vector<8x1xf32> to vector<8x16xf32>
    %260 = arith.mulf %258, %259 : vector<8x16xf32>
    %cst_83 = arith.constant 1.000000e+00 : f32
    %261 = vector.broadcast %cst_83 : f32 to vector<8x16xf32>
    %262 = arith.mulf %260, %261 : vector<8x16xf32>
    %cst_84 = arith.constant 0.000000e+00 : f32
    %263 = vector.broadcast %cst_84 : f32 to vector<8x16xf32>
    %264 = arith.addf %262, %263 : vector<8x16xf32>
    %265 = vector.broadcast %257 : vector<1x16xf32> to vector<8x16xf32>
    %266 = vector.broadcast %235 : vector<8x1xf32> to vector<8x16xf32>
    %267 = arith.mulf %265, %266 : vector<8x16xf32>
    %cst_85 = arith.constant 5.000000e-01 : f32
    %268 = vector.broadcast %cst_85 : f32 to vector<8x16xf32>
    %269 = arith.mulf %267, %268 : vector<8x16xf32>
    %cst_86 = arith.constant 0.000000e+00 : f32
    %270 = vector.broadcast %cst_86 : f32 to vector<8x16xf32>
    %271 = arith.addf %269, %270 : vector<8x16xf32>
    %272 = arith.mulf %236, %264 : vector<8x16xf32>
    %273 = arith.addf %272, %271 : vector<8x16xf32>
    %274 = arith.maximumf %255, %273 : vector<8x16xf32>
    %c24 = arith.constant 24 : index
    %c0_87 = arith.constant 0 : index
    %275 = vector.load %arg8[%c24, %c0_87] : memref<32x16xf32, #tpu.memory_space<vmem>>, vector<8x16xf32>
    tpu.vector_store %arg8[%c24, %c0_87], %274 {strides = array<i32>} : memref<32x16xf32, #tpu.memory_space<vmem>>, vector<8x16xf32>,
    return
  }
  func.func @transform_0(%arg0: i32) -> (i32, i32) {
    %c0_i32 = arith.constant 0 : i32
    %c0_i32_0 = arith.constant 0 : i32
    return %arg0, %c0_i32 : i32, i32
  }
  func.func @transform_1(%arg0: i32) -> (i32, i32, i32) {
    %c0_i32 = arith.constant 0 : i32
    %c0_i32_0 = arith.constant 0 : i32
    %c0_i32_1 = arith.constant 0 : i32
    return %arg0, %c0_i32, %c0_i32_0 : i32, i32, i32
  }
  func.func @transform_2(%arg0: i32) -> (i32, i32, i32) {
    %c0_i32 = arith.constant 0 : i32
    %c0_i32_0 = arith.constant 0 : i32
    %c0_i32_1 = arith.constant 0 : i32
    return %arg0, %c0_i32, %c0_i32_0 : i32, i32, i32
  }
  func.func @transform_3(%arg0: i32) -> (i32, i32) {
    %c0_i32 = arith.constant 0 : i32
    %c0_i32_0 = arith.constant 0 : i32
    %c0_i32_1 = arith.constant 0 : i32
    return %c0_i32, %c0_i32_0 : i32, i32
  }
  func.func @transform_4(%arg0: i32) -> (i32, i32) {
    %c0_i32 = arith.constant 0 : i32
    %c0_i32_0 = arith.constant 0 : i32
    %c0_i32_1 = arith.constant 0 : i32
    return %c0_i32, %c0_i32_0 : i32, i32
  }
  func.func @transform_5(%arg0: i32) -> (i32, i32) {
    %c0_i32 = arith.constant 0 : i32
    %c0_i32_0 = arith.constant 0 : i32
    %c0_i32_1 = arith.constant 0 : i32
    return %c0_i32, %c0_i32_0 : i32, i32
  }
  func.func @transform_6(%arg0: i32) -> (i32, i32) {
    %c0_i32 = arith.constant 0 : i32
    %c0_i32_0 = arith.constant 0 : i32
    %c0_i32_1 = arith.constant 0 : i32
    return %c0_i32, %c0_i32_0 : i32, i32
  }
  func.func @transform_7(%arg0: i32) -> (i32, i32) {
    %c0_i32 = arith.constant 0 : i32
    %c0_i32_0 = arith.constant 0 : i32
    return %arg0, %c0_i32 : i32, i32
  }
}

</mosaic_0001>

<bundles_post_ra>
// kernel: tpu_custom_call.1
= control target key start
LH: loop header
LB: loop body
LE: loop exit
PB: predicated region body
PF: predicated region fallthrough
CT: control target
= control target key end

     0   :  { %vm33_vm0 = vcmask 130048   ;;  %s535_s12 = smov 124   ;;  %vm79_vm1 = vcmask 261120   ;;  %vm113_vm2 = vcmask 1043456   ;;  %vm166_vm3 = vcmask 64512   ;;  %s538_s24 = smov 96   ;;  %s680_s3 = inlined_call_operand.vmem [shape: f32[16,5], index: 3, kind: input, shape index: {}]   ;;  %s681_s0 = inlined_call_operand.vmem [shape: f32[32,16], index: 0, kind: input, shape index: {}]   ;;  %s682_s4 = inlined_call_operand.vmem [shape: f32[1,5], index: 4, kind: input, shape index: {}]   ;;  %s683_s2 = inlined_call_operand.vmem [shape: f32[1,4,32], index: 2, kind: input, shape index: {}]   ;;  %s684_s5 = inlined_call_operand.vmem [shape: f32[4,64], index: 5, kind: input, shape index: {}]   ;;  %s685_s1 = inlined_call_operand.vmem [shape: f32[4,8,8], index: 1, kind: input, shape index: {}]   ;;  %s686_s6 = inlined_call_operand.vmem [shape: f32[1,64], index: 6, kind: input, shape index: {}]   ;;  %s687_s7 = inlined_call_operand.vmem [shape: f32[32,16], index: 7, kind: output, shape index: {}]  }
   0x1   :  { %v32_v0 = vld [vmem:[%s680_s3 + $0x8] sm:$0xff]  ;;  %v31_v1 = vld [vmem:[%s680_s3] sm:$0xff]  ;;  %v594_v3 = vld [vmem:[%s681_s0 + $0x18] sm:$0xff]  ;;  %vm109_vm4 = vcmask 31744   ;;  %vm191_vm5 = vcmask 7168   ;;  %v536_v54 = vmov 0  }
   0x2   :  { %60 = vmatpush.msra.mxu0 %v32_v0  ;;  %498 = vmatpush.msra.mxu2 %v32_v0  ;;  %v589_v2 = vld [vmem:[%s681_s0] sm:$0xff]  ;;  %v603_v4 = vld [vmem:[%s681_s0 + $0x8] sm:$0xff]  ;;  %v610_v5 = vld [vmem:[%s681_s0 + $0x10] sm:$0xff]  ;;  %s539_s25 = smov 80  }
   0x3   :  { %v75_v11 = vld [vmem:[%s683_s2] sm:$0xf]  ;;  %v496_v16 = vld [vmem:[%s685_s1 + $0x18] sm:$0xff]  ;;  %v494_v21 = vld [vmem:[%s685_s1 + $0x10] sm:$0xff]  ;;  %512 = vset.pattern.permute.xlu1 %v536_v54  ;;  %510 = vset.pattern.permute.xlu2 %v536_v54 }
   0x4   :  { %61 = vmatpush.msra.mxu0 %v31_v1  ;;  %499 = vmatpush.msra.mxu2 %v31_v1  ;;  %v513_v12 = vld [vmem:[%s682_s4] ss:$0 sm:$0xff]  ;;  %v492_v25 = vld [vmem:[%s685_s1 + $0x8] sm:$0xff] }
   0x5   :  { %482 = vmatmul.msk.f32.vlgmr.msra.gmra.mxu0 %vm33_vm0, %v589_v2  ;;  %485 = vmatmul.msk.f32.vlgmr.msra.gmra.mxu2 %vm33_vm0, %v594_v3  ;;  %v104_v13 = vld [vmem:[%s684_s5] sm:$0xf] }
   0x6   :  { %487 = vmatpush.msk.msrb.mxu2 %vm113_vm2, %v104_v13  ;;  %v158_v14 = vld [vmem:[%s685_s1] sm:$0xff]  ;;  %511 = vset.pattern.permute.xlu0 %v536_v54 }
   0xd   :  { %483 = vmatmul.msk.f32.gmra.mxu0 %vm33_vm0, %v603_v4 }
  0x15   :  { %484 = vmatmul.msk.f32.gmra.mxu0 %vm33_vm0, %v610_v5 }
  0x82   :  { %v63_v6 = vpop.f32.mrf.mxu0 }
  0x83   :  { %160 = vrot.lane.b32.xlu0 %v63_v6, %s535_s12 }
  0x88   :  { %v72_v7 = vpop.f32.mrf.mxu2 }
  0x89   :  { %402 = vrot.lane.b32.xlu1 %v72_v7, %s535_s12  ;;  %95 = vmatpush.msra.mxu1 %v72_v7 }
  0x8a   :  { %v66_v8 = vpop.f32.mrf.mxu0 }
  0x91   :  { %163 = vrot.lane.b32.xlu1 %v513_v12, %s535_s12 }
  0x92   :  { %v69_v9 = vpop.f32.mrf.mxu0 }
  0x93   :  { %v505_v10 = vpack.i.bf16 %v69_v9, %v66_v8  ;;  %96 = vmatpush.msra.mxu1 %v69_v9 }
  0x95   :  { %506 = vrot.lane.b32.xlu0 %v505_v10, %s535_s12  ;;  %97 = vmatpush.msra.mxu1 %v66_v8 }
  0x97   :  { %98 = vmatpush.msra.mxu1 %v63_v6 }
  0x98   :  { %486 = vmatmul.msk.f32.vlgmr.msra.gmra.mxu1 %vm79_vm1, %v75_v11 }
  0xf5   :  { %v161_v15 = vpop.permute.xlu0 %160 }
  0xf6   :  { %185 = vmatpush.msra.mxu3 %v161_v15 }
  0xf7   :  { %491 = vmatmul.msk.f32.vlgmr.msra.gmra.mxu3 %vm166_vm3, %v158_v14 }
  0xfb   :  { %v403_v17 = vpop.permute.xlu1 %402 }
  0xfc   :  { %423 = vmatpush.msrb.mxu1 %v403_v17 }
  0xfd   :  { %497 = vmatmul.msk.f32.vlgmr.msrb.gmra.mxu1 %vm166_vm3, %v496_v16 }
 0x103   :  { %v639_v26 = vpop.permute.xlu1 %163 }
 0x107   :  { %v507_v18 = vpop.permute.xlu0 %506 }
 0x108   :  { %v508_v19 = vunpack.i.l.bf16 %v507_v18  ;;  %v509_v20 = vunpack.i.h.bf16 %v507_v18 }
 0x10a   :  { %265 = vmatpush.msra.mxu2 %v508_v19  ;;  %344 = vmatpush.msrb.mxu3 %v509_v20 }
 0x10b   :  { %495 = vmatmul.msk.f32.vlgmr.msrb.gmra.mxu3 %vm166_vm3, %v494_v21 }
 0x115   :  { %v100_v22 = vpop.f32.mrf.mxu1 }
 0x116   :  { %v101_v23 = vadd.f32 %v513_v12, %v100_v22 }
 0x118   :  { %v103_v24 = vmax.f32 %v101_v23, 0.0 }
 0x11a   :  { %488 = vmatmul.msk.f32.vlgmr.msrb.gmra.mxu2 %vm109_vm4, %v103_v24 }
 0x122   :  { %493 = vmatmul.msk.f32.vlgmr.msra.gmra.mxu2 %vm166_vm3, %v492_v25 }
 0x17a   :  { %v187_v27 = vpop.f32.mrf.mxu3  ;;  %v425_v28 = vpop.f32.mrf.mxu1 }
 0x17b   :  { %v188_v29 = vadd.f32 %v187_v27, %v639_v26  ;;  %v426_v30 = vadd.f32 %v425_v28, %v639_v26 }
 0x17d   :  { %v190_v31 = vmul.f32 0.1, %v188_v29  ;;  %v428_v32 = vmul.f32 0.1, %v426_v30 }
 0x17f   :  { %v192_v33 = vsel %vm191_vm5, %v190_v31, -inf  ;;  %v429_v34 = vsel %vm191_vm5, %v428_v32, -inf }
 0x180   :  { %v193_v35 = vrot.slane %v192_v33, 4  ;;  %v430_v36 = vrot.slane %v429_v34, 4 }
 0x182   :  { %v194_v37 = vmax.f32 %v192_v33, %v193_v35  ;;  %v431_v38 = vmax.f32 %v429_v34, %v430_v36 }
 0x184   :  { %v195_v39 = vrot.slane %v194_v37, 2  ;;  %v432_v40 = vrot.slane %v431_v38, 2 }
 0x186   :  { %v196_v41 = vmax.f32 %v194_v37, %v195_v39  ;;  %v433_v42 = vmax.f32 %v431_v38, %v432_v40 }
 0x188   :  { %v197_v43 = vrot.slane %v196_v41, 1  ;;  %v434_v44 = vrot.slane %v433_v42, 1 }
 0x18a   :  { %v198_v45 = vmax.f32 %v196_v41, %v197_v43  ;;  %v435_v46 = vmax.f32 %v433_v42, %v434_v44 }
 0x18c   :  { %v199_v47 = vsub.f32 %v190_v31, %v198_v45  ;;  %v436_v48 = vsub.f32 %v428_v32, %v435_v46 }
 0x18e   :  { %v200_v49 = vmul.f32 1.442695, %v199_v47  ;;  %v437_v50 = vmul.f32 1.442695, %v436_v48  ;;  %v346_v51 = vpop.f32.mrf.mxu3 }
 0x18f   :  { %v347_v52 = vadd.f32 %v346_v51, %v639_v26 }
 0x190   :  { %515 = vpow2.f32 %v200_v49 }
 0x191   :  { %517 = vpow2.f32 %v437_v50  ;;  %v349_v53 = vmul.f32 0.1, %v347_v52 }
 0x193   :  { %v350_v55 = vsel %vm191_vm5, %v349_v53, -inf }
 0x194   :  { %v351_v56 = vrot.slane %v350_v55, 4 }
 0x196   :  { %v516_v57 = vpop.eup %515  ;;  %v352_v58 = vmax.f32 %v350_v55, %v351_v56 }
 0x197   :  { %v518_v59 = vpop.eup %517  ;;  %v202_v60 = vsel %vm191_vm5, %v516_v57, 0.0 }
 0x198   :  { %v203_v61 = vrot.slane %v202_v60, 4  ;;  %v439_v62 = vsel %vm191_vm5, %v518_v59, 0.0  ;;  %v353_v63 = vrot.slane %v352_v58, 2 }
 0x199   :  { %v440_v0 = vrot.slane %v439_v62, 4 }
 0x19a   :  { %v204_v1 = vadd.f32 %v203_v61, %v202_v60  ;;  %v354_v6 = vmax.f32 %v352_v58, %v353_v63 }
 0x19b   :  { %v441_v7 = vadd.f32 %v440_v0, %v439_v62 }
 0x19c   :  { %v355_v8 = vrot.slane %v354_v6, 1  ;;  %v205_v9 = vrot.slane %v204_v1, 2 }
 0x19d   :  { %v442_v10 = vrot.slane %v441_v7, 2  ;;  %v134_v11 = vpop.f32.mrf.mxu2 }
 0x19e   :  { %v356_v12 = vmax.f32 %v354_v6, %v355_v8  ;;  %v206_v13 = vadd.f32 %v205_v9, %v204_v1 }
 0x19f   :  { %v443_v14 = vadd.f32 %v442_v10, %v441_v7 }
 0x1a0   :  { %v357_v15 = vsub.f32 %v349_v53, %v356_v12  ;;  %v207_v16 = vrot.slane %v206_v13, 1 }
 0x1a1   :  { %v444_v17 = vrot.slane %v443_v14, 1 }
 0x1a2   :  { %v358_v18 = vmul.f32 1.442695, %v357_v15  ;;  %v208_v19 = vadd.f32 %v207_v16, %v206_v13 }
 0x1a3   :  { %v445_v20 = vadd.f32 %v444_v17, %v443_v14 }
 0x1a4   :  { %519 = vpow2.f32 %v358_v18 }
 0x1a5   :  { %v267_v21 = vpop.f32.mrf.mxu2  ;;  %521 = vrcp.f32 %v208_v19 }
 0x1a6   :  { %v268_v22 = vadd.f32 %v267_v21, %v639_v26  ;;  %523 = vrcp.f32 %v445_v20 }
 0x1a8   :  { %v270_v23 = vmul.f32 0.1, %v268_v22 }
 0x1aa   :  { %v520_v24 = vpop.eup %519  ;;  %v271_v25 = vsel %vm191_vm5, %v270_v23, -inf }
 0x1ab   :  { %v522_v27 = vpop.eup %521  ;;  %v360_v28 = vsel %vm191_vm5, %v520_v24, 0.0  ;;  %v272_v31 = vrot.slane %v271_v25, 4 }
 0x1ac   :  { %v524_v29 = vpop.eup %523  ;;  %v361_v30 = vrot.slane %v360_v28, 4  ;;  %v210_v32 = vmul.f32 %v522_v27, %v516_v57 }
 0x1ad   :  { %v447_v33 = vmul.f32 %v524_v29, %v518_v59  ;;  %v273_v35 = vmax.f32 %v271_v25, %v272_v31  ;;  %v514_v59 = vld [vmem:[%s686_s6] ss:$0 sm:$0xff]  ;;  %s537_s6 = smov 112  }
 0x1ae   :  { %v362_v34 = vadd.f32 %v361_v30, %v360_v28  ;;  %v211_v36 = vmul.f32 2.6666667, %v210_v32  ;;  %v135_v62 = vadd.f32 %v514_v59, %v134_v11 }
 0x1af   :  { %v448_v37 = vmul.f32 2.6666667, %v447_v33  ;;  %v274_v39 = vrot.slane %v273_v35, 2 }
 0x1b0   :  { %v363_v38 = vrot.slane %v362_v34, 2  ;;  %v212_v26 = vmin.f32 %v211_v36, 1.0  ;;  %v489_v63 = vmul.f32 -1.442695, %v135_v62 }
 0x1b1   :  { %v449_v40 = vmin.f32 %v448_v37, 1.0  ;;  %v275_v42 = vmax.f32 %v273_v35, %v274_v39 }
 0x1b2   :  { %v364_v41 = vadd.f32 %v363_v38, %v362_v34  ;;  %216 = vperm.xlu2 %510, %v212_v26  }
 0x1b3   :  { %453 = vperm.xlu1 %512, %v449_v40   ;;  %v276_v43 = vrot.slane %v275_v42, 1 }
 0x1b4   :  { %v365_v44 = vrot.slane %v364_v41, 1 }
 0x1b5   :  { %v277_v45 = vmax.f32 %v275_v42, %v276_v43 }
 0x1b6   :  { %v366_v46 = vadd.f32 %v365_v44, %v364_v41 }
 0x1b7   :  { %v278_v47 = vsub.f32 %v270_v23, %v277_v45 }
 0x1b8   :  { %525 = vrcp.f32 %v366_v46 }
 0x1b9   :  { %v279_v48 = vmul.f32 1.442695, %v278_v47 }
 0x1bb   :  { %527 = vpow2.f32 %v279_v48 }
 0x1be   :  { %v526_v49 = vpop.eup %525 }
 0x1bf   :  { %v368_v50 = vmul.f32 %v526_v49, %v520_v24 }
 0x1c1   :  { %v369_v51 = vmul.f32 2.6666667, %v368_v50  ;;  %v528_v52 = vpop.eup %527 }
 0x1c2   :  { %v281_v53 = vsel %vm191_vm5, %v528_v52, 0.0 }
 0x1c3   :  { %v370_v54 = vmin.f32 %v369_v51, 1.0  ;;  %v282_v55 = vrot.slane %v281_v53, 4 }
 0x1c5   :  { %374 = vperm.xlu0 %511, %v370_v54   ;;  %v283_v56 = vadd.f32 %v282_v55, %v281_v53 }
 0x1c7   :  { %v284_v57 = vrot.slane %v283_v56, 2 }
 0x1c9   :  { %v285_v58 = vadd.f32 %v284_v57, %v283_v56 }
 0x1cb   :  { %v286_v60 = vrot.slane %v285_v58, 1 }
 0x1cd   :  { %v287_v61 = vadd.f32 %v286_v60, %v285_v58 }
 0x1cf   :  { %529 = vrcp.f32 %v287_v61 }
 0x1d0   :  { %531 = vpow2.f32 %v489_v63 }
 0x1d5   :  { %v530_v0 = vpop.eup %529 }
 0x1d6   :  { %v289_v1 = vmul.f32 %v530_v0, %v528_v52  ;;  %v532_v8 = vpop.eup %531 }
 0x1d7   :  { %v140_v9 = vadd.f32 1.0, %v532_v8 }
 0x1d8   :  { %v290_v6 = vmul.f32 2.6666667, %v289_v1 }
 0x1d9   :  { %533 = vrcp.f32 %v140_v9  ;;  %v152_v16 = vand.u32 2147483648, %v140_v9  ;;  %vm146_vm7 = vweird.f32 %v140_v9  ;;  %v150_v11 = vand.u32 2147483647, %v140_v9 }
 0x1da   :  { %v291_v7 = vmin.f32 %v290_v6, 1.0 }
 0x1db   :  { %v153_v18 = vor.u32 1.1754944e-38, %v152_v16  ;;  %vm151_vm9 = vcmp.eq.f32.partialorder %v150_v11, 8.507059e+37 }
 0x1dc   :  { %295 = vperm.xlu2 %510, %v291_v7  }
 0x1df   :  { %v534_v10 = vpop.eup %533 }
 0x1e0   :  { %v142_v12 = vmul.f32 %v534_v10, %v140_v9  ;;  %vm147_vm6 = vweird.f32 %v534_v10 }
 0x1e1   :  { %vm148_vm8 = vmor %vm146_vm7, %vm147_vm6 }
 0x1e2   :  { %v143_v13 = vsub.f32 1.0, %v142_v12 }
 0x1e4   :  { %v144_v14 = vmul.f32 %v534_v10, %v143_v13 }
 0x1e6   :  { %v145_v15 = vadd.f32 %v534_v10, %v144_v14 }
 0x1e8   :  { %v149_v17 = vsel %vm148_vm8, %v534_v10, %v145_v15 }
 0x1e9   :  { %v154_v19 = vsel %vm151_vm9, %v153_v18, %v149_v17 }
 0x1ea   :  { %v156_v20 = vmul.f32 2.0, %v154_v19 }
 0x1ec   :  { %v490_v21 = vadd.f32 -1.0, %v156_v20 }
 0x1ee   :  { %v213_v22 = vperm.slane %v490_v21, 0  ;;  %v450_v27 = vperm.slane %v490_v21, 3  ;;  %v292_v30 = vperm.slane %v490_v21, 1  ;;  %v371_v31 = vperm.slane %v490_v21, 2 }
 0x20c   :  { %v217_v23 = vpop.permute.xlu2 %216 }
 0x20d   :  { %v219_v24 = vmul.f32 %v217_v23, %v213_v22 }
 0x20f   :  { %231 = vrot.lane.b32.xlu2 %v219_v24, %s537_s6  ;;  %v221_v25 = vmul.f32 0.5, %v219_v24  ;;  %v220_v26 = vadd.f32 1.0, %v219_v24 }
 0x211   :  { %225 = vrot.lane.b32.xlu1 %v221_v25, %s538_s24  ;;  %v223_v42 = vmul.f32 %v220_v26, %v589_v2 }
 0x217   :  { %235 = vrot.lane.b32.xlu2 %v221_v25, %s539_s25 }
 0x225   :  { %v454_v28 = vpop.permute.xlu1 %453 }
 0x226   :  { %v456_v29 = vmul.f32 %v454_v28, %v450_v27 }
 0x228   :  { %468 = vrot.lane.b32.xlu0 %v456_v29, %s537_s6  ;;  %v458_v38 = vmul.f32 0.5, %v456_v29  ;;  %v457_v0 = vadd.f32 1.0, %v456_v29 }
 0x236   :  { %v296_v32 = vpop.permute.xlu2 %295 }
 0x237   :  { %v375_v33 = vpop.permute.xlu0 %374  ;;  %v298_v34 = vmul.f32 %v296_v32, %v292_v30 }
 0x238   :  { %v377_v35 = vmul.f32 %v375_v33, %v371_v31 }
 0x239   :  { %310 = vrot.lane.b32.xlu1 %v298_v34, %s537_s6  ;;  %v300_v36 = vmul.f32 0.5, %v298_v34  ;;  %v299_v51 = vadd.f32 1.0, %v298_v34 }
 0x23a   :  { %389 = vrot.lane.b32.xlu2 %v377_v35, %s537_s6  ;;  %v379_v37 = vmul.f32 0.5, %v377_v35  ;;  %v378_v53 = vadd.f32 1.0, %v377_v35 }
 0x23b   :  { %304 = vrot.lane.b32.xlu0 %v300_v36, %s538_s24 }
 0x23c   :  { %v381_v57 = vmul.f32 %v378_v53, %v610_v5 }
 0x241   :  { %314 = vrot.lane.b32.xlu1 %v300_v36, %s539_s25 }
 0x242   :  { %383 = vrot.lane.b32.xlu2 %v379_v37, %s538_s24 }
 0x243   :  { %393 = vrot.lane.b32.xlu0 %v379_v37, %s539_s25 }
 0x249   :  { %462 = vrot.lane.b32.xlu1 %v458_v38, %s538_s24 }
 0x24a   :  { %472 = vrot.lane.b32.xlu2 %v458_v38, %s539_s25 }
 0x269   :  { %v232_v39 = vpop.permute.xlu2 %231 }
 0x26a   :  { %v234_v41 = vmul.f32 %v232_v39, %v589_v2  ;;  %v302_v2 = vmul.f32 %v299_v51, %v603_v4 }
 0x271   :  { %v236_v40 = vpop.permute.xlu2 %235 }
 0x272   :  { %v238_v44 = vadd.f32 %v236_v40, %v234_v41 }
 0x283   :  { %v226_v43 = vpop.permute.xlu1 %225 }
 0x284   :  { %v228_v45 = vadd.f32 %v226_v43, %v223_v42 }
 0x286   :  { %v239_v46 = vmax.f32 %v228_v45, %v238_v44 }
 0x288   :  { %240 = vst.msk [vmem:[%s687_s7] sm:$0xff] %vm33_vm0, %v239_v46 }
 0x294   :  { %v390_v47 = vpop.permute.xlu2 %389 }
 0x295   :  { %v392_v56 = vmul.f32 %v390_v47, %v610_v5  ;;  %v460_v5 = vmul.f32 %v457_v0, %v594_v3 }
 0x29a   :  { %v469_v48 = vpop.permute.xlu0 %468 }
 0x29c   :  { %v384_v52 = vpop.permute.xlu2 %383 }
 0x29d   :  { %v386_v61 = vadd.f32 %v384_v52, %v381_v57 }
 0x2a4   :  { %v473_v6 = vpop.permute.xlu2 %472 }
 0x2ab   :  { %v311_v49 = vpop.permute.xlu1 %310 }
 0x2ac   :  { %v313_v54 = vmul.f32 %v311_v49, %v603_v4  ;;  %v471_v4 = vmul.f32 %v469_v48, %v594_v3 }
 0x2ad   :  { %v305_v50 = vpop.permute.xlu0 %304 }
 0x2ae   :  { %v307_v58 = vadd.f32 %v305_v50, %v302_v2  ;;  %v475_v8 = vadd.f32 %v473_v6, %v471_v4 }
 0x2b3   :  { %v315_v55 = vpop.permute.xlu1 %314 }
 0x2b4   :  { %v317_v59 = vadd.f32 %v315_v55, %v313_v54 }
 0x2b5   :  { %v394_v60 = vpop.permute.xlu0 %393 }
 0x2b6   :  { %v318_v62 = vmax.f32 %v307_v58, %v317_v59  ;;  %v396_v63 = vadd.f32 %v394_v60, %v392_v56 }
 0x2b8   :  { %319 = vst.msk [vmem:[%s687_s7 + $0x8] sm:$0xff] %vm33_vm0, %v318_v62  ;;  %v397_v1 = vmax.f32 %v386_v61, %v396_v63 }
 0x2ba   :  { %398 = vst.msk [vmem:[%s687_s7 + $0x10] sm:$0xff] %vm33_vm0, %v397_v1 }
 0x2bb   :  { %v463_v7 = vpop.permute.xlu1 %462 }
 0x2bc   :  { %v465_v9 = vadd.f32 %v463_v7, %v460_v5 }
 0x2be   :  { %v476_v10 = vmax.f32 %v465_v9, %v475_v8 }
 0x2c0   :  { %477 = vst.msk [vmem:[%s687_s7 + $0x18] sm:$0xff] %vm33_vm0, %v476_v10 }

</bundles_post_ra>
